<compile_context>
chip_gen: v7x
topology: tpu7x:2x2x1
jax: 0.10.0
libtpu: 0.0.40
codegen_flags: <defaults>
</compile_context>

<pallas_src>
import jax
import jax.numpy as jnp
from jax.experimental import pallas as pl
from jax.experimental.pallas import tpu as pltpu


def unembed_kernel(x_ref, w_ref, b_ref, o_ref, acc_ref):
    # x_ref:   (tm, tk)      activation tile (compute dtype, e.g. bf16)
    # w_ref:   (tv, tk)      W_U tile in native [d_vocab, d_model] layout
    # b_ref:   (1,  tv)      bias tile (f32)
    # o_ref:   (tm, tv)      output logits tile
    # acc_ref: (tm, tv) f32  accumulator scratch (lives across the k axis)
    k = pl.program_id(2)
    nk = pl.num_programs(2)

    @pl.when(k == 0)
    def _():
        acc_ref[...] = jnp.zeros_like(acc_ref)

    # Contract x's axis 1 with W_U's axis 1 (i.e. x @ W_U^T) — the MXU takes
    # the transposed RHS natively, so no host/wrapper transpose is needed.
    partial = jax.lax.dot_general(
        x_ref[...],
        w_ref[...],
        dimension_numbers=(((1,), (1,)), ((), ())),
        preferred_element_type=jnp.float32,
    )

    @pl.when(k < nk - 1)
    def _():
        acc_ref[...] += partial

    @pl.when(k == nk - 1)
    def _():
        # Fused epilogue: fold the last partial product straight into the
        # output store instead of doing an extra accumulator RMW.
        o_ref[...] = (
            acc_ref[...] + partial + b_ref[...].astype(jnp.float32)
        ).astype(o_ref.dtype)


def _round_up(x: int, m: int) -> int:
    return ((x + m - 1) // m) * m


def _cdiv(a: int, b: int) -> int:
    return (a + b - 1) // b


def unembed_forward(res, w_u, b_u, *, tm=1024, tv=1024, tk=512,
                    compute_dtype=jnp.bfloat16):
    """res: (batch, position, d_model); w_u: (d_vocab, d_model); b_u: (d_vocab,).

    Returns logits of shape (batch, position, d_vocab) in res.dtype.
    Matmuls run in `compute_dtype` with an f32 accumulator and f32 bias-add.
    """
    B, S, D = res.shape
    V, D_w = w_u.shape
    assert D_w == D, "W_U must be (d_vocab, d_model)"
    M = B * S
    out_dtype = res.dtype

    # Activations flattened; operands cast to the (cheap) compute dtype.
    x2d = res.reshape(M, D).astype(compute_dtype)
    w = w_u.astype(compute_dtype)            # native (V, D) layout — no transpose
    b2d = b_u.reshape(1, V).astype(jnp.float32)

    # Balanced tile sizes (avoid a nearly-empty trailing tile), aligned to the
    # (8, 128) vreg layout.
    tm_eff = min(_round_up(_cdiv(M, _cdiv(M, tm)), 8), _round_up(M, 8))
    tv_eff = min(_round_up(_cdiv(V, _cdiv(V, tv)), 128), _round_up(V, 128))
    if D <= tk:
        tk_eff = D                            # single full-K block (legal: == full dim)
    else:
        tk_eff = tk

    Mp = _round_up(M, tm_eff)
    Vp = _round_up(V, tv_eff)
    Dp = _round_up(D, tk_eff)

    # Zero-pad only when the problem doesn't divide the tile grid (zeros are
    # inert in the dot product; padded rows/cols are sliced off afterwards).
    # For typical d_model / d_vocab (multiples of 128/512) these are no-ops,
    # so the big weight array incurs no extra HBM copy.
    if (Mp, Dp) != (M, D):
        x2d = jnp.pad(x2d, ((0, Mp - M), (0, Dp - D)))
    if (Vp, Dp) != (V, D):
        w = jnp.pad(w, ((0, Vp - V), (0, Dp - D)))
    if Vp != V:
        b2d = jnp.pad(b2d, ((0, 0), (0, Vp - V)))

    grid = (Mp // tm_eff, Vp // tv_eff, Dp // tk_eff)

    out2d = pl.pallas_call(
        unembed_kernel,
        out_shape=jax.ShapeDtypeStruct((Mp, Vp), out_dtype),
        grid_spec=pltpu.PrefetchScalarGridSpec(
            num_scalar_prefetch=0,
            grid=grid,
            in_specs=[
                pl.BlockSpec((tm_eff, tk_eff), lambda i, j, k: (i, k)),  # x
                pl.BlockSpec((tv_eff, tk_eff), lambda i, j, k: (j, k)),  # W_U (native)
                pl.BlockSpec((1, tv_eff), lambda i, j, k: (0, j)),       # bias
            ],
            out_specs=pl.BlockSpec((tm_eff, tv_eff), lambda i, j, k: (i, j)),
            scratch_shapes=[pltpu.VMEM((tm_eff, tv_eff), jnp.float32)],
        ),
        compiler_params=pltpu.CompilerParams(
            # Row / vocab tiles are independent (megacore-shardable on v7x);
            # the d_model reduction axis must stay "arbitrary" and last.
            dimension_semantics=("parallel", "parallel", "arbitrary"),
            # Default tiles give a ~16 MiB footprint (acc 4 MiB f32 + bf16
            # double-buffered I/O) — safe on v7x's 64 MiB physical VMEM and
            # well within this 48 MiB scoped request.  On v6e/v5e (128 MiB)
            # pass tm=2048 and raise this limit for even fewer weight re-reads.
            vmem_limit_bytes=48 * 1024 * 1024,
        ),
    )(x2d, w, b2d)

    return out2d[:M, :V].reshape(B, S, V)


if __name__ == "__main__":
    # Small config consistent with the module: d_model=32, d_vocab=1024.
    batch, seq, d_model, d_vocab = 2, 8, 32, 1024

    key = jax.random.PRNGKey(0)
    k_x, k_w, k_b = jax.random.split(key, 3)

    res = jax.random.normal(k_x, (batch, seq, d_model), dtype=jnp.float32)
    # "nn.Linear"-style params in PyTorch layout [out_features, in_features].
    w_u = jax.random.normal(k_w, (d_vocab, d_model), dtype=jnp.float32) * 0.05
    b_u = jax.random.normal(k_b, (d_vocab,), dtype=jnp.float32) * 0.05

    # Full-precision reference.
    ref = (
        jnp.einsum("bsd,vd->bsv", res, w_u, precision=jax.lax.Precision.HIGHEST)
        + b_u
    )

    # Default performance path: bf16 operands, f32 accumulation.
    logits = unembed_forward(res, w_u, b_u)
    jax.block_until_ready(logits)
    assert logits.shape == (batch, seq, d_vocab)
    assert jnp.allclose(logits, ref, atol=2e-2, rtol=2e-2), "bf16 path mismatch"

    # Full-f32 compute path (small d_model, so default MXU precision is plenty).
    logits_f32 = unembed_forward(res, w_u, b_u, compute_dtype=jnp.float32)
    jax.block_until_ready(logits_f32)
    assert jnp.allclose(logits_f32, ref, atol=1e-2, rtol=1e-2), "f32 path mismatch"

    print("KERNEL_OK")
</pallas_src>

<mosaic_0001>
module attributes {stable_mosaic.version = 11 : i64} {
  func.func @unembed_kernel(%arg0: i32, %arg1: i32, %arg2: i32, %arg3: memref<16x32xbf16, #tpu.memory_space<vmem>>, %arg4: memref<1024x32xbf16, #tpu.memory_space<vmem>>, %arg5: memref<1x1024xf32, #tpu.memory_space<vmem>>, %arg6: memref<16x1024xf32, #tpu.memory_space<vmem>>, %arg7: memref<16x1024xf32, #tpu.memory_space<vmem>>) attributes {dimension_semantics = [#tpu.dimension_semantics<parallel>, #tpu.dimension_semantics<parallel>, #tpu.dimension_semantics<arbitrary>], iteration_bounds = array<i64: 1, 1, 1>, scalar_prefetch = 0 : i64, scratch_operands = 1 : i64, tpu.core_type = #tpu.core_type<tc>, window_params = [{transform_indices = @transform_0, window_bounds = array<i64: 16, 32>}, {transform_indices = @transform_1, window_bounds = array<i64: 1024, 32>}, {transform_indices = @transform_2, window_bounds = array<i64: 1, 1024>}, {transform_indices = @transform_3, window_bounds = array<i64: 16, 1024>}]} {
    %c0_i32 = arith.constant 0 : i32
    %0 = arith.cmpi eq, %arg2, %c0_i32 : i32
    %1 = arith.extui %0 : i1 to i32
    %c0_i32_0 = arith.constant 0 : i32
    %2 = arith.cmpi ne, %1, %c0_i32_0 : i32
    scf.if %2 {
      %cst_8 = arith.constant 0.000000e+00 : f32
      %12 = vector.broadcast %cst_8 : f32 to vector<16x1024xf32>
      %c0_9 = arith.constant 0 : index
      %c0_10 = arith.constant 0 : index
      %13 = vector.load %arg7[%c0_9, %c0_10] : memref<16x1024xf32, #tpu.memory_space<vmem>>, vector<16x1024xf32>
      tpu.vector_store %arg7[%c0_9, %c0_10], %12 {strides = array<i32>} : memref<16x1024xf32, #tpu.memory_space<vmem>>, vector<16x1024xf32>,
    } else {
    }
    %c0 = arith.constant 0 : index
    %c0_1 = arith.constant 0 : index
    %3 = vector.load %arg3[%c0, %c0_1] : memref<16x32xbf16, #tpu.memory_space<vmem>>, vector<16x32xbf16>
    %c0_2 = arith.constant 0 : index
    %c0_3 = arith.constant 0 : index
    %4 = vector.load %arg4[%c0_2, %c0_3] : memref<1024x32xbf16, #tpu.memory_space<vmem>>, vector<1024x32xbf16>
    %cst = arith.constant dense<0.000000e+00> : vector<16x1024xf32>
    %5 = tpu.matmul %3, %4, %cst {dimension_numbers = #tpu.dot_dimension_numbers<[1], [1], [0], [0], [0, 0, 1, 0], [], []>} : vector<16x32xbf16>, vector<1024x32xbf16>, vector<16x1024xf32> -> vector<16x1024xf32>
    %c0_i32_4 = arith.constant 0 : i32
    %6 = arith.cmpi slt, %arg2, %c0_i32_4 : i32
    %7 = arith.extui %6 : i1 to i32
    %c0_i32_5 = arith.constant 0 : i32
    %8 = arith.cmpi ne, %7, %c0_i32_5 : i32
    scf.if %8 {
      %c0_8 = arith.constant 0 : index
      %c0_9 = arith.constant 0 : index
      %12 = vector.load %arg7[%c0_8, %c0_9] : memref<16x1024xf32, #tpu.memory_space<vmem>>, vector<16x1024xf32>
      %13 = arith.addf %12, %5 : vector<16x1024xf32>
      %c0_10 = arith.constant 0 : index
      %c0_11 = arith.constant 0 : index
      %14 = vector.load %arg7[%c0_10, %c0_11] : memref<16x1024xf32, #tpu.memory_space<vmem>>, vector<16x1024xf32>
      tpu.vector_store %arg7[%c0_10, %c0_11], %13 {strides = array<i32>} : memref<16x1024xf32, #tpu.memory_space<vmem>>, vector<16x1024xf32>,
    } else {
    }
    %c0_i32_6 = arith.constant 0 : i32
    %9 = arith.cmpi eq, %arg2, %c0_i32_6 : i32
    %10 = arith.extui %9 : i1 to i32
    %c0_i32_7 = arith.constant 0 : i32
    %11 = arith.cmpi ne, %10, %c0_i32_7 : i32
    scf.if %11 {
      %c0_8 = arith.constant 0 : index
      %c0_9 = arith.constant 0 : index
      %12 = vector.load %arg7[%c0_8, %c0_9] : memref<16x1024xf32, #tpu.memory_space<vmem>>, vector<16x1024xf32>
      %13 = arith.addf %12, %5 : vector<16x1024xf32>
      %c0_10 = arith.constant 0 : index
      %c0_11 = arith.constant 0 : index
      %14 = vector.load %arg5[%c0_10, %c0_11] : memref<1x1024xf32, #tpu.memory_space<vmem>>, vector<1x1024xf32>
      %15 = vector.broadcast %14 : vector<1x1024xf32> to vector<16x1024xf32>
      %16 = arith.addf %13, %15 : vector<16x1024xf32>
      %c0_12 = arith.constant 0 : index
      %c0_13 = arith.constant 0 : index
      %17 = vector.load %arg6[%c0_12, %c0_13] : memref<16x1024xf32, #tpu.memory_space<vmem>>, vector<16x1024xf32>
      tpu.vector_store %arg6[%c0_12, %c0_13], %16 {strides = array<i32>} : memref<16x1024xf32, #tpu.memory_space<vmem>>, vector<16x1024xf32>,
    } else {
    }
    return
  }
  func.func @transform_0(%arg0: i32, %arg1: i32, %arg2: i32) -> (i32, i32) {
    %c0_i32 = arith.constant 0 : i32
    return %arg0, %arg2 : i32, i32
  }
  func.func @transform_1(%arg0: i32, %arg1: i32, %arg2: i32) -> (i32, i32) {
    %c0_i32 = arith.constant 0 : i32
    return %arg1, %arg2 : i32, i32
  }
  func.func @transform_2(%arg0: i32, %arg1: i32, %arg2: i32) -> (i32, i32) {
    %c0_i32 = arith.constant 0 : i32
    %c0_i32_0 = arith.constant 0 : i32
    return %c0_i32, %arg1 : i32, i32
  }
  func.func @transform_3(%arg0: i32, %arg1: i32, %arg2: i32) -> (i32, i32) {
    %c0_i32 = arith.constant 0 : i32
    return %arg0, %arg1 : i32, i32
  }
}

</mosaic_0001>

<bundles_post_ra>
// kernel: tpu_custom_call.1
= control target key start
LH: loop header
LB: loop body
LE: loop exit
PB: predicated region body
PF: predicated region fallthrough
CT: control target
= control target key end

     0   :  { %vm491_vm0 = vcmask 261120   ;;  %s1616_s0 = inlined_call_operand.vmem [shape: bf16[16,32], index: 0, kind: input, shape index: {}]   ;;  %s1617_s1 = inlined_call_operand.vmem [shape: bf16[1024,32], index: 1, kind: input, shape index: {}]   ;;  %s1618_s2 = inlined_call_operand.vmem [shape: f32[1,1024], index: 2, kind: input, shape index: {}]   ;;  %s1619_s3 = inlined_call_operand.hbm [shape: f32[16,1024], index: 3, kind: output, shape index: {}]  }
   0x1   :  { %v1212_v0 = vld [vmem:[%s1617_s1 + $0x40] sm:$0xff]   ;;  %v1216_v5 = vld [vmem:[%s1617_s1 + $0x48] sm:$0xff]   ;;  %v1220_v11 = vld [vmem:[%s1617_s1 + $0x50] sm:$0xff]  }
   0x2   :  { %v1213_v1 = vld [vmem:[%s1617_s1 + $0xc0] sm:$0xff]   ;;  %1177 = vmatprep.subr.msk.bf16.mxu0 %vm491_vm0, %v1212_v0  ;;  %v1217_v7 = vld [vmem:[%s1617_s1 + $0xc8] sm:$0xff]   ;;  %v1221_v13 = vld [vmem:[%s1617_s1 + $0xd0] sm:$0xff]  }
   0x3   :  { %v1214_v2 = vld [vmem:[%s1617_s1] sm:$0xff]   ;;  %1185 = vmatprep.subr.msk.bf16.mxu1 %vm491_vm0, %v1213_v1  ;;  %v1218_v8 = vld [vmem:[%s1617_s1 + $0x8] sm:$0xff]   ;;  %v1222_v14 = vld [vmem:[%s1617_s1 + $0x10] sm:$0xff]  }
   0x4   :  { %v1215_v3 = vld [vmem:[%s1617_s1 + $0x80] sm:$0xff]   ;;  %v496_v4 = vsel %vm491_vm0, %v1214_v2, 0  ;;  %v1219_v9 = vld [vmem:[%s1617_s1 + $0x88] sm:$0xff]   ;;  %v499_v10 = vsel %vm491_vm0, %v1218_v8, 0  ;;  %v1223_v15 = vld [vmem:[%s1617_s1 + $0x90] sm:$0xff]   ;;  %v502_v16 = vsel %vm491_vm0, %v1222_v14, 0 }
   0x5   :  { %1106 = vmatpush3.bf16.xpose.msra.mxu0 %v496_v4  ;;  %v544_v6 = vsel %vm491_vm0, %v1215_v3, 0  ;;  %v547_v12 = vsel %vm491_vm0, %v1219_v9, 0  ;;  %v1224_v17 = vld [vmem:[%s1617_s1 + $0x58] sm:$0xff]   ;;  %v550_v18 = vsel %vm491_vm0, %v1223_v15, 0  ;;  %v1228_v23 = vld [vmem:[%s1617_s1 + $0x60] sm:$0xff]   ;;  %v1232_v30 = vld [vmem:[%s1617_s1 + $0x68] sm:$0xff]  }
   0x6   :  { %1124 = vmatpush3.bf16.xpose.msra.mxu1 %v544_v6  ;;  %1178 = vmatprep.subr.msk.bf16.mxu0 %vm491_vm0, %v1216_v5  ;;  %v1225_v19 = vld [vmem:[%s1617_s1 + $0xd8] sm:$0xff]   ;;  %v1229_v25 = vld [vmem:[%s1617_s1 + $0xe0] sm:$0xff]   ;;  %v1233_v32 = vld [vmem:[%s1617_s1 + $0xe8] sm:$0xff]  }
   0x7   :  { %1186 = vmatprep.subr.msk.bf16.mxu1 %vm491_vm0, %v1217_v7  ;;  %v1226_v20 = vld [vmem:[%s1617_s1 + $0x18] sm:$0xff]   ;;  %v1230_v26 = vld [vmem:[%s1617_s1 + $0x20] sm:$0xff]   ;;  %v1234_v33 = vld [vmem:[%s1617_s1 + $0x28] sm:$0xff]  }
   0x8   :  { %v1227_v21 = vld [vmem:[%s1617_s1 + $0x98] sm:$0xff]   ;;  %v505_v22 = vsel %vm491_vm0, %v1226_v20, 0  ;;  %v1231_v27 = vld [vmem:[%s1617_s1 + $0xa0] sm:$0xff]   ;;  %v508_v29 = vsel %vm491_vm0, %v1230_v26, 0  ;;  %v1235_v34 = vld [vmem:[%s1617_s1 + $0xa8] sm:$0xff]   ;;  %v511_v35 = vsel %vm491_vm0, %v1234_v33, 0 }
   0x9   :  { %v553_v24 = vsel %vm491_vm0, %v1227_v21, 0  ;;  %v1405_v28 = vld [vmem:[%s1616_s0] sm:$0xff]   ;;  %v556_v31 = vsel %vm491_vm0, %v1231_v27, 0  ;;  %v1236_v36 = vld [vmem:[%s1617_s1 + $0x70] sm:$0xff]   ;;  %v559_v37 = vsel %vm491_vm0, %v1235_v34, 0  ;;  %v1240_v42 = vld [vmem:[%s1617_s1 + $0x78] sm:$0xff]  }
   0xa   :  { %1121 = vmatprep.mubr.msk.bf16.mxu0 %vm491_vm0, %v1405_v28  ;;  %1139 = vmatprep.mubr.msk.bf16.mxu1 %vm491_vm0, %v1405_v28  ;;  %v1237_v38 = vld [vmem:[%s1617_s1 + $0xf0] sm:$0xff]   ;;  %v1241_v44 = vld [vmem:[%s1617_s1 + $0xf8] sm:$0xff]   ;;  %v1245_v48 = vld [vmem:[%s1617_s1 + $0x140] sm:$0xff]  }
   0xb   :  { %v1238_v39 = vld [vmem:[%s1617_s1 + $0x30] sm:$0xff]   ;;  %v1242_v45 = vld [vmem:[%s1617_s1 + $0x38] sm:$0xff]   ;;  %v1246_v50 = vld [vmem:[%s1617_s1 + $0x1c0] sm:$0xff]  }
   0xc   :  { %v1239_v40 = vld [vmem:[%s1617_s1 + $0xb0] sm:$0xff]   ;;  %v514_v41 = vsel %vm491_vm0, %v1238_v39, 0  ;;  %v1243_v46 = vld [vmem:[%s1617_s1 + $0xb8] sm:$0xff]   ;;  %v517_v47 = vsel %vm491_vm0, %v1242_v45, 0  ;;  %v1247_v51 = vld [vmem:[%s1617_s1 + $0x100] sm:$0xff]  }
   0xd   :  { %1108 = vmatpush3.bf16.xpose.msra.mxu0 %v499_v10  ;;  %v562_v43 = vsel %vm491_vm0, %v1239_v40, 0  ;;  %v565_v49 = vsel %vm491_vm0, %v1243_v46, 0  ;;  %v1248_v52 = vld [vmem:[%s1617_s1 + $0x180] sm:$0xff]  }
   0xe   :  { %1126 = vmatpush3.bf16.xpose.msra.mxu1 %v547_v12  ;;  %1179 = vmatprep.subr.msk.bf16.mxu0 %vm491_vm0, %v1220_v11 }
   0xf   :  { %1187 = vmatprep.subr.msk.bf16.mxu1 %vm491_vm0, %v1221_v13 }
  0x15   :  { %1110 = vmatpush3.bf16.xpose.msra.mxu0 %v502_v16 }
  0x16   :  { %1128 = vmatpush3.bf16.xpose.msra.mxu1 %v550_v18  ;;  %1180 = vmatprep.subr.msk.bf16.mxu0 %vm491_vm0, %v1224_v17 }
  0x17   :  { %1188 = vmatprep.subr.msk.bf16.mxu1 %vm491_vm0, %v1225_v19 }
  0x1d   :  { %1112 = vmatpush3.bf16.xpose.msra.mxu0 %v505_v22 }
  0x1e   :  { %1130 = vmatpush3.bf16.xpose.msra.mxu1 %v553_v24  ;;  %1181 = vmatprep.subr.msk.bf16.mxu0 %vm491_vm0, %v1228_v23 }
  0x1f   :  { %1189 = vmatprep.subr.msk.bf16.mxu1 %vm491_vm0, %v1229_v25 }
  0x25   :  { %1114 = vmatpush3.bf16.xpose.msra.mxu0 %v508_v29 }
  0x26   :  { %1132 = vmatpush3.bf16.xpose.msra.mxu1 %v556_v31  ;;  %1182 = vmatprep.subr.msk.bf16.mxu0 %vm491_vm0, %v1232_v30 }
  0x27   :  { %1190 = vmatprep.subr.msk.bf16.mxu1 %vm491_vm0, %v1233_v32 }
  0x2d   :  { %1116 = vmatpush3.bf16.xpose.msra.mxu0 %v511_v35 }
  0x2e   :  { %1134 = vmatpush3.bf16.xpose.msra.mxu1 %v559_v37  ;;  %1183 = vmatprep.subr.msk.bf16.mxu0 %vm491_vm0, %v1236_v36 }
  0x2f   :  { %1191 = vmatprep.subr.msk.bf16.mxu1 %vm491_vm0, %v1237_v38 }
  0x35   :  { %1118 = vmatpush3.bf16.xpose.msra.mxu0 %v514_v41 }
  0x36   :  { %1136 = vmatpush3.bf16.xpose.msra.mxu1 %v562_v43  ;;  %1184 = vmatprep.subr.msk.bf16.mxu0 %vm491_vm0, %v1240_v42 }
  0x37   :  { %1192 = vmatprep.subr.msk.bf16.mxu1 %vm491_vm0, %v1241_v44 }
  0x3d   :  { %1120 = vmatpush3.bf16.xpose.msra.mxu0 %v517_v47 }
  0x3e   :  { %1138 = vmatpush3.bf16.xpose.msra.mxu1 %v565_v49  ;;  %1193 = vmatprep.subr.msk.bf16.mxu0 %vm491_vm0, %v1245_v48 }
  0x3f   :  { %1201 = vmatprep.subr.msk.bf16.mxu1 %vm491_vm0, %v1246_v50 }
  0x40   :  { %8 = vsyncpa [#allocation4], 0  ;;  %v592_v53 = vsel %vm491_vm0, %v1247_v51, 0  ;;  %v1249_v54 = vld [vmem:[%s1617_s1 + $0x148] sm:$0xff]   ;;  %v640_v55 = vsel %vm491_vm0, %v1248_v52, 0  ;;  %v1253_v60 = vld [vmem:[%s1617_s1 + $0x150] sm:$0xff]   ;;  %v948_v34 = vlaneseq }
  0x41   :  { %v1250_v56 = vld [vmem:[%s1617_s1 + $0x1c8] sm:$0xff]   ;;  %v1254_v62 = vld [vmem:[%s1617_s1 + $0x1d0] sm:$0xff]   ;;  %v1257_v2 = vld [vmem:[%s1617_s1 + $0x158] sm:$0xff]  }
  0x42   :  { %v1251_v57 = vld [vmem:[%s1617_s1 + $0x108] sm:$0xff]   ;;  %v1255_v63 = vld [vmem:[%s1617_s1 + $0x110] sm:$0xff]   ;;  %v1258_v4 = vld [vmem:[%s1617_s1 + $0x1d8] sm:$0xff]   ;;  %v949_v35 = vshrl.u32 %v948_v34, 7 }
  0x43   :  { %v1252_v58 = vld [vmem:[%s1617_s1 + $0x188] sm:$0xff]   ;;  %v595_v59 = vsel %vm491_vm0, %v1251_v57, 0  ;;  %v1256_v0 = vld [vmem:[%s1617_s1 + $0x190] sm:$0xff]   ;;  %v598_v1 = vsel %vm491_vm0, %v1255_v63, 0  ;;  %v1259_v5 = vld [vmem:[%s1617_s1 + $0x118] sm:$0xff]  }
  0x44   :  { %1122 = vmatmul.mubr.msk.bf16.vlgmr.msra.gmra.mrb[0].mxu0 %vm491_vm0, %v1405_v28  ;;  %v643_v61 = vsel %vm491_vm0, %v1252_v58, 0  ;;  %v646_v3 = vsel %vm491_vm0, %v1256_v0, 0  ;;  %v1260_v6 = vld [vmem:[%s1617_s1 + $0x198] sm:$0xff]   ;;  %v601_v7 = vsel %vm491_vm0, %v1259_v5, 0  ;;  %v1261_v8 = vld [vmem:[%s1617_s1 + $0x160] sm:$0xff]   ;;  %v1265_v14 = vld [vmem:[%s1617_s1 + $0x168] sm:$0xff]  }
  0x45   :  { %1140 = vmatmul.mubr.msk.bf16.vlgmr.msra.gmra.mrb[0].mxu1 %vm491_vm0, %v1405_v28  ;;  %1142 = vmatpush3.bf16.xpose.msra.mxu0 %v592_v53  ;;  %v649_v9 = vsel %vm491_vm0, %v1260_v6, 0  ;;  %v1262_v10 = vld [vmem:[%s1617_s1 + $0x1e0] sm:$0xff]   ;;  %v1266_v16 = vld [vmem:[%s1617_s1 + $0x1e8] sm:$0xff]   ;;  %v1269_v20 = vld [vmem:[%s1617_s1 + $0x170] sm:$0xff]   ;;  %v966_v36 = vsub.s32 4, %v949_v35  ;;  %v974_v37 = vsub.s32 6, %v949_v35 }
  0x46   :  { %1160 = vmatpush3.bf16.xpose.msra.mxu1 %v640_v55  ;;  %1194 = vmatprep.subr.msk.bf16.mxu0 %vm491_vm0, %v1249_v54  ;;  %v1263_v11 = vld [vmem:[%s1617_s1 + $0x120] sm:$0xff]   ;;  %v1267_v17 = vld [vmem:[%s1617_s1 + $0x128] sm:$0xff]   ;;  %v1270_v22 = vld [vmem:[%s1617_s1 + $0x1f0] sm:$0xff]   ;;  %v970_v39 = vsub.s32 5, %v949_v35  ;;  %v978_v40 = vsub.s32 7, %v949_v35  ;;  %v950_v45 = vsub.s32 0, %v949_v35 }
  0x47   :  { %1202 = vmatprep.subr.msk.bf16.mxu1 %vm491_vm0, %v1250_v56  ;;  %1157 = vmatprep.mubr.msk.bf16.mxu0 %vm491_vm0, %v1405_v28  ;;  %v1264_v12 = vld [vmem:[%s1617_s1 + $0x1a0] sm:$0xff]   ;;  %v604_v13 = vsel %vm491_vm0, %v1263_v11, 0  ;;  %v1268_v18 = vld [vmem:[%s1617_s1 + $0x1a8] sm:$0xff]   ;;  %v607_v19 = vsel %vm491_vm0, %v1267_v17, 0  ;;  %v1271_v23 = vld [vmem:[%s1617_s1 + $0x130] sm:$0xff]   ;;  %v958_v46 = vsub.s32 2, %v949_v35 }
  0x48   :  { %1175 = vmatprep.mubr.msk.bf16.mxu1 %vm491_vm0, %v1405_v28  ;;  %v652_v15 = vsel %vm491_vm0, %v1264_v12, 0  ;;  %v655_v21 = vsel %vm491_vm0, %v1268_v18, 0  ;;  %v1272_v24 = vld [vmem:[%s1617_s1 + $0x1b0] sm:$0xff]   ;;  %v610_v25 = vsel %vm491_vm0, %v1271_v23, 0  ;;  %v1273_v26 = vld [vmem:[%s1617_s1 + $0x178] sm:$0xff]   ;;  %v946_v38 = vld [vmem:[%s1618_s2] sm:$0xff] }
  0x49   :  { %v658_v27 = vsel %vm491_vm0, %v1272_v24, 0  ;;  %v1274_v29 = vld [vmem:[%s1617_s1 + $0x1f8] sm:$0xff]   ;;  %v967_v41 = vrot.slane %v946_v38, %v966_v36  ;;  %v975_v42 = vrot.slane %v946_v38, %v974_v37  ;;  %v971_v43 = vrot.slane %v946_v38, %v970_v39 }
  0x4a   :  { %v1275_v30 = vld [vmem:[%s1617_s1 + $0x138] sm:$0xff]   ;;  %v979_v44 = vrot.slane %v946_v38, %v978_v40  ;;  %v954_v47 = vsub.s32 1, %v949_v35  ;;  %v962_v48 = vsub.s32 3, %v949_v35  ;;  %v951_v49 = vrot.slane %v946_v38, %v950_v45 }
  0x4b   :  { %v1276_v31 = vld [vmem:[%s1617_s1 + $0x1b8] sm:$0xff]   ;;  %v613_v32 = vsel %vm491_vm0, %v1275_v30, 0  ;;  %s1301_s1 = smov [#allocation3]  }
  0x4c   :  { %v661_v33 = vsel %vm491_vm0, %v1276_v31, 0  ;;  %v955_v50 = vrot.slane %v946_v38, %v954_v47  ;;  %v963_v51 = vrot.slane %v946_v38, %v962_v48  ;;  %s1025_s2 = sshll.u32 %s1301_s1, 4  ;;  %s1026_s2 = int_to_ptr.vmem [resolvable:$true] %s1025_s2 }
  0x4d   :  { %1144 = vmatpush3.bf16.xpose.msra.mxu0 %v595_v59  ;;  %s1277_s5 = scalar_lea.vmem %s1026_s2, 2048  ;;  %p1282_p1 = scmp.lt.s32.totalorder %s1026_s2, %s1026_s2 }
  0x4e   :  { %1162 = vmatpush3.bf16.xpose.msra.mxu1 %v643_v61  ;;  %1195 = vmatprep.subr.msk.bf16.mxu0 %vm491_vm0, %v1253_v60  ;;  %p1278_p0 = scmp.ne.s32.totalorder %s1026_s2, %s1277_s5  ;;  %p1283_p2 = scmp.lt.s32.totalorder %s1277_s5, %s1277_s5 }
  0x4f   :  { %1203 = vmatprep.subr.msk.bf16.mxu1 %vm491_vm0, %v1254_v62 }
  0x50   :  { %p1284_p3 = por %p1283_p2, %p1282_p1 }
  0x52   :  { %p1285_p4 = pnand %p1284_p3, %p1278_p0 }
  0x55   :  { %1146 = vmatpush3.bf16.xpose.msra.mxu0 %v598_v1 }
  0x56   :  { %1164 = vmatpush3.bf16.xpose.msra.mxu1 %v646_v3  ;;  %1196 = vmatprep.subr.msk.bf16.mxu0 %vm491_vm0, %v1257_v2 }
  0x57   :  { %1204 = vmatprep.subr.msk.bf16.mxu1 %vm491_vm0, %v1258_v4 }
  0x5d   :  { %1148 = vmatpush3.bf16.xpose.msra.mxu0 %v601_v7 }
  0x5e   :  { %1166 = vmatpush3.bf16.xpose.msra.mxu1 %v649_v9  ;;  %1197 = vmatprep.subr.msk.bf16.mxu0 %vm491_vm0, %v1261_v8 }
  0x5f   :  { %1205 = vmatprep.subr.msk.bf16.mxu1 %vm491_vm0, %v1262_v10 }
  0x65   :  { %1150 = vmatpush3.bf16.xpose.msra.mxu0 %v604_v13 }
  0x66   :  { %1168 = vmatpush3.bf16.xpose.msra.mxu1 %v652_v15  ;;  %1198 = vmatprep.subr.msk.bf16.mxu0 %vm491_vm0, %v1265_v14 }
  0x67   :  { %1206 = vmatprep.subr.msk.bf16.mxu1 %vm491_vm0, %v1266_v16 }
  0x6d   :  { %1152 = vmatpush3.bf16.xpose.msra.mxu0 %v607_v19 }
  0x6e   :  { %1170 = vmatpush3.bf16.xpose.msra.mxu1 %v655_v21  ;;  %1199 = vmatprep.subr.msk.bf16.mxu0 %vm491_vm0, %v1269_v20 }
  0x6f   :  { %1207 = vmatprep.subr.msk.bf16.mxu1 %vm491_vm0, %v1270_v22 }
  0x75   :  { %1154 = vmatpush3.bf16.xpose.msra.mxu0 %v610_v25 }
  0x76   :  { %1172 = vmatpush3.bf16.xpose.msra.mxu1 %v658_v27  ;;  %1200 = vmatprep.subr.msk.bf16.mxu0 %vm491_vm0, %v1273_v26 }
  0x77   :  { %1208 = vmatprep.subr.msk.bf16.mxu1 %vm491_vm0, %v1274_v29 }
  0x7d   :  { %1156 = vmatpush3.bf16.xpose.msra.mxu0 %v613_v32 }
  0x7e   :  { %1174 = vmatpush3.bf16.xpose.msra.mxu1 %v661_v33 }
  0x84   :  { %1158 = vmatmul.mubr.msk.bf16.vlgmr.msra.gmra.mrb[4].mxu0 %vm491_vm0, %v1405_v28 }
  0x85   :  { %1176 = vmatmul.mubr.msk.bf16.vlgmr.msra.gmra.mrb[4].mxu1 %vm491_vm0, %v1405_v28  ;;  %v959_v28 = vrot.slane %v946_v38, %v958_v46 }
 0x117   :  { %v721_v52 = vpop.f32.mrb[0].mxu0 }
 0x118   :  { %v988_v53 = vadd.f32 %v951_v49, %v721_v52  ;;  %v764_v54 = vpop.f32.mrb[0].mxu1  ;;  %v723_v55 = vpop.f32.mrb[1].mxu0 }
 0x119   :  { %v990_v56 = vadd.f32 %v959_v28, %v764_v54  ;;  %v989_v57 = vadd.f32 %v955_v50, %v723_v55  ;;  %v766_v58 = vpop.f32.mrb[1].mxu1  ;;  %v725_v59 = vpop.f32.mrb[2].mxu0 }
 0x11a   :  { %1004 = vst [vmem:[#allocation3] sm:$0xff] %v988_v53  ;;  %v991_v60 = vadd.f32 %v963_v51, %v766_v58  ;;  %v996_v61 = vadd.f32 %v951_v49, %v725_v59  ;;  %v768_v62 = vpop.f32.mrb[2].mxu1  ;;  %v727_v63 = vpop.f32.mrb[3].mxu0 }
 0x11b   :  { %1006 = vst [vmem:[#allocation3 + $0x10] sm:$0xff] %v990_v56  ;;  %1005 = vst [vmem:[#allocation3 + $0x8] sm:$0xff] %v989_v57  ;;  %v998_v0 = vadd.f32 %v959_v28, %v768_v62  ;;  %v997_v1 = vadd.f32 %v955_v50, %v727_v63  ;;  %v770_v2 = vpop.f32.mrb[3].mxu1 }
 0x11c   :  { %1007 = vst [vmem:[#allocation3 + $0x18] sm:$0xff] %v991_v60  ;;  %1012 = vst [vmem:[#allocation3 + $0x40] sm:$0xff] %v996_v61  ;;  %v999_v3 = vadd.f32 %v963_v51, %v770_v2 }
 0x11d   :  { %1014 = vst [vmem:[#allocation3 + $0x50] sm:$0xff] %v998_v0  ;;  %1013 = vst [vmem:[#allocation3 + $0x48] sm:$0xff] %v997_v1 }
 0x11e   :  { %1015 = vst [vmem:[#allocation3 + $0x58] sm:$0xff] %v999_v3 }
 0x157   :  { %v807_v4 = vpop.f32.mrb[4].mxu0 }
 0x158   :  { %v992_v5 = vadd.f32 %v967_v41, %v807_v4  ;;  %v850_v6 = vpop.f32.mrb[4].mxu1  ;;  %v809_v7 = vpop.f32.mrb[5].mxu0 }
 0x159   :  { %v994_v8 = vadd.f32 %v975_v42, %v850_v6  ;;  %v993_v9 = vadd.f32 %v971_v43, %v809_v7  ;;  %v852_v10 = vpop.f32.mrb[5].mxu1  ;;  %v811_v11 = vpop.f32.mrb[6].mxu0 }
 0x15a   :  { %1008 = vst [vmem:[#allocation3 + $0x20] sm:$0xff] %v992_v5  ;;  %v995_v12 = vadd.f32 %v979_v44, %v852_v10  ;;  %v1000_v13 = vadd.f32 %v967_v41, %v811_v11  ;;  %v854_v14 = vpop.f32.mrb[6].mxu1  ;;  %v813_v15 = vpop.f32.mrb[7].mxu0 }
 0x15b   :  { %1010 = vst [vmem:[#allocation3 + $0x30] sm:$0xff] %v994_v8  ;;  %1009 = vst [vmem:[#allocation3 + $0x28] sm:$0xff] %v993_v9  ;;  %v1002_v16 = vadd.f32 %v975_v42, %v854_v14  ;;  %v1001_v17 = vadd.f32 %v971_v43, %v813_v15  ;;  %v856_v18 = vpop.f32.mrb[7].mxu1 }
 0x15c   :  { %1011 = vst [vmem:[#allocation3 + $0x38] sm:$0xff] %v995_v12  ;;  %1016 = vst [vmem:[#allocation3 + $0x60] sm:$0xff] %v1000_v13  ;;  %v1003_v19 = vadd.f32 %v979_v44, %v856_v18 }
 0x15d   :  { %1018 = vst [vmem:[#allocation3 + $0x70] sm:$0xff] %v1002_v16  ;;  %1017 = vst [vmem:[#allocation3 + $0x68] sm:$0xff] %v1001_v17 }
 0x15e   :  { %1019 = vst [vmem:[#allocation3 + $0x78] sm:$0xff] %v1003_v19 }
 0x15f   :  { %1288 = shalt.err (!%p1285_p4)
}
 0x160   :  { %s1289_s8 = scalar_lea.hbm %s1619_s3, 2048 }
 0x161   :  { %p1290_p5 = scmp.ne.s32.totalorder %s1619_s3, %s1289_s8  ;;  %p1293_p6 = scmp.lt.u32.totalorder %s1289_s8, %s1619_s3 }
 0x163   :  { %p1295_p7 = pnand %p1293_p6, %p1290_p5 }
 0x165   :  { %1298 = shalt.err (!%p1295_p7)
}
 0x166   :  { %s1302_s13 = smov 1024   ;;  %s1303_s14 = smov 64  }
 0x167   :  { %1031 = dma.vmem_to_hbm [thread:$0]  %s1026_s2, 2048, %s1619_s3, [#allocation4], %s1302_s13, %s1302_s13, %s1303_s14  }
 0x168   :  { %1299 = dma.done.wait [#allocation4], 2048  }
 0x169   :  { %1300 = vsyncadd [#allocation4], 4294965248 }
 0x16a   :  { %1035 = vsyncpa [#allocation4], 1 }

</bundles_post_ra>
